<compile_context>
chip_gen: v5e
topology: v5e:2x2
jax: 0.10.0
libtpu: 0.0.40
codegen_flags: <defaults>
</compile_context>

<pallas_src>
import math

import jax
import jax.numpy as jnp
from jax.experimental import pallas as pl
from jax.experimental.pallas import tpu as pltpu


_LANE = 128            # TPU lane width
_MAX_TN = 2048         # max lane-tile (multiple of 128)
_MAX_TB = 256          # max sublane/batch tile (multiple of 8)
_SMALL_BYTES = 1 << 20 # below this, let XLA fuse the elementwise op


def _scale_shift_kernel(x_ref, scale_ref, shift_ref, o_ref):
    # Pure VPU fused multiply-add; (1, tn) params broadcast over the
    # (tb, tn) activation block along the sublane (batch) axis.
    o_ref[...] = x_ref[...] * scale_ref[...] + shift_ref[...]


def _pallas_scale_shift_2d(x2, s2, t2, tb, tn):
    b_pad, n_pad = x2.shape
    grid = (n_pad // tn, b_pad // tb)  # N-tiles outer, batch-tiles inner
    return pl.pallas_call(
        _scale_shift_kernel,
        out_shape=jax.ShapeDtypeStruct((b_pad, n_pad), x2.dtype),
        grid=grid,
        in_specs=[
            pl.BlockSpec((tb, tn), lambda ni, bi: (bi, ni)),
            pl.BlockSpec((1, tn), lambda ni, bi: (0, ni)),
            pl.BlockSpec((1, tn), lambda ni, bi: (0, ni)),
        ],
        out_specs=pl.BlockSpec((tb, tn), lambda ni, bi: (bi, ni)),
        compiler_params=pltpu.CompilerParams(
            dimension_semantics=("parallel", "parallel"),
        ),
    )(x2, s2, t2)


def scale_shift(x, scale_param, shift_param, *, use_pallas=None):
    """Apply y = x * scale + shift.

    x:           (B, *shape)
    scale_param: (*shape)
    shift_param: (*shape)
    """
    orig_shape = x.shape
    B = x.shape[0]
    N = math.prod(x.shape[1:])

    if use_pallas is None:
        use_pallas = x.size * x.dtype.itemsize >= _SMALL_BYTES
    if not use_pallas:
        # Tiny input: fused XLA elementwise is strictly faster than a kernel.
        return x * scale_param + shift_param

    x2 = x.reshape(B, N)
    s2 = scale_param.reshape(1, N).astype(x.dtype)
    t2 = shift_param.reshape(1, N).astype(x.dtype)

    # --- tile selection -----------------------------------------------------
    # Lane axis: pad N to a multiple of 128, pick tn <= 2048, then pad N up to
    # a multiple of tn so every block is full and lane-dense (unmasked stores).
    n128 = pl.cdiv(N, _LANE) * _LANE
    tn = min(n128, _MAX_TN)
    n_pad = pl.cdiv(n128, tn) * tn

    # Batch axis: full batch in one block when small (full-dim blocks are
    # always legal); otherwise tile with tb=256 and pad B to a multiple of it.
    if B <= _MAX_TB:
        tb, b_pad = B, B
    else:
        tb = _MAX_TB
        b_pad = pl.cdiv(B, tb) * tb

    # --- pad -> kernel -> slice ----------------------------------------------
    if b_pad != B or n_pad != N:
        x2 = jnp.pad(x2, ((0, b_pad - B), (0, n_pad - N)))
    if n_pad != N:
        s2 = jnp.pad(s2, ((0, 0), (0, n_pad - N)))
        t2 = jnp.pad(t2, ((0, 0), (0, n_pad - N)))

    out = _pallas_scale_shift_2d(x2, s2, t2, tb, tn)
    return out[:B, :N].reshape(orig_shape)


class ScaleShiftPallas:
    """JAX/Pallas port of the PyTorch ScaleShift module (forward pass)."""

    def __init__(self, shape, scale=True, shift=True):
        self.shape = shape
        # `scale` / `shift` only toggle requires_grad in PyTorch; the forward
        # pass always applies both params, so we keep them for repr only.
        self.scale = scale
        self.shift = shift
        self.scale_param = jnp.ones(shape, dtype=jnp.float32)
        self.shift_param = jnp.zeros(shape, dtype=jnp.float32)

    def __call__(self, x, *, use_pallas=None):
        return scale_shift(x, self.scale_param, self.shift_param,
                           use_pallas=use_pallas)

    def __repr__(self):
        return "ScaleShiftPallas(shape={}, scale={}, shift={})".format(
            self.shape, self.scale, self.shift)


if __name__ == "__main__":
    key = jax.random.PRNGKey(0)
    kx, ks, kt = jax.random.split(key, 3)

    # Module shape excludes batch: (depth, height, width) = (4, 16, 16)
    B, C, H, W = 2, 4, 16, 16
    x = jax.random.normal(kx, (B, C, H, W), dtype=jnp.float32)

    # 1) Module forward (ones/zeros params, exactly as PyTorch init).
    #    Force the Pallas path so the kernel actually compiles + runs.
    module = ScaleShiftPallas((C, H, W), scale=True, shift=True)
    y = module(x, use_pallas=True)
    y = jax.block_until_ready(y)
    y_ref = x * module.scale_param + module.shift_param
    assert y.shape == x.shape and y.dtype == x.dtype
    assert jnp.allclose(y, y_ref, atol=1e-6, rtol=1e-6)

    # 2) Nontrivial scale/shift to exercise the FMA + broadcasting path.
    scale_p = jax.random.normal(ks, (C, H, W), dtype=jnp.float32)
    shift_p = jax.random.normal(kt, (C, H, W), dtype=jnp.float32)
    y2 = scale_shift(x, scale_p, shift_p, use_pallas=True)
    y2 = jax.block_until_ready(y2)
    y2_ref = x * scale_p + shift_p
    assert jnp.allclose(y2, y2_ref, atol=1e-6, rtol=1e-6)

    print("KERNEL_OK")
</pallas_src>

<mosaic_0001>
module attributes {stable_mosaic.version = 11 : i64} {
  func.func @_scale_shift_kernel(%arg0: i32, %arg1: i32, %arg2: memref<2x1024xf32, #tpu.memory_space<vmem>>, %arg3: memref<1x1024xf32, #tpu.memory_space<vmem>>, %arg4: memref<1x1024xf32, #tpu.memory_space<vmem>>, %arg5: memref<2x1024xf32, #tpu.memory_space<vmem>>) attributes {dimension_semantics = [#tpu.dimension_semantics<parallel>, #tpu.dimension_semantics<parallel>], iteration_bounds = array<i64: 1, 1>, scalar_prefetch = 0 : i64, scratch_operands = 0 : i64, tpu.core_type = #tpu.core_type<tc>, window_params = [{transform_indices = @transform_0, window_bounds = array<i64: 2, 1024>}, {transform_indices = @transform_1, window_bounds = array<i64: 1, 1024>}, {transform_indices = @transform_2, window_bounds = array<i64: 1, 1024>}, {transform_indices = @transform_3, window_bounds = array<i64: 2, 1024>}]} {
    %c0 = arith.constant 0 : index
    %c0_0 = arith.constant 0 : index
    %0 = vector.load %arg2[%c0, %c0_0] : memref<2x1024xf32, #tpu.memory_space<vmem>>, vector<2x1024xf32>
    %c0_1 = arith.constant 0 : index
    %c0_2 = arith.constant 0 : index
    %1 = vector.load %arg3[%c0_1, %c0_2] : memref<1x1024xf32, #tpu.memory_space<vmem>>, vector<1x1024xf32>
    %2 = vector.broadcast %1 : vector<1x1024xf32> to vector<2x1024xf32>
    %3 = arith.mulf %0, %2 : vector<2x1024xf32>
    %c0_3 = arith.constant 0 : index
    %c0_4 = arith.constant 0 : index
    %4 = vector.load %arg4[%c0_3, %c0_4] : memref<1x1024xf32, #tpu.memory_space<vmem>>, vector<1x1024xf32>
    %5 = vector.broadcast %4 : vector<1x1024xf32> to vector<2x1024xf32>
    %6 = arith.addf %3, %5 : vector<2x1024xf32>
    %c0_5 = arith.constant 0 : index
    %c0_6 = arith.constant 0 : index
    %7 = vector.load %arg5[%c0_5, %c0_6] : memref<2x1024xf32, #tpu.memory_space<vmem>>, vector<2x1024xf32>
    tpu.vector_store %arg5[%c0_5, %c0_6], %6 {strides = array<i32>} : memref<2x1024xf32, #tpu.memory_space<vmem>>, vector<2x1024xf32>,
    return
  }
  func.func @transform_0(%arg0: i32, %arg1: i32) -> (i32, i32) {
    %c0_i32 = arith.constant 0 : i32
    return %arg1, %arg0 : i32, i32
  }
  func.func @transform_1(%arg0: i32, %arg1: i32) -> (i32, i32) {
    %c0_i32 = arith.constant 0 : i32
    %c0_i32_0 = arith.constant 0 : i32
    return %c0_i32, %arg0 : i32, i32
  }
  func.func @transform_2(%arg0: i32, %arg1: i32) -> (i32, i32) {
    %c0_i32 = arith.constant 0 : i32
    %c0_i32_0 = arith.constant 0 : i32
    return %c0_i32, %arg0 : i32, i32
  }
  func.func @transform_3(%arg0: i32, %arg1: i32) -> (i32, i32) {
    %c0_i32 = arith.constant 0 : i32
    return %arg1, %arg0 : i32, i32
  }
}

</mosaic_0001>

<bundles_post_ra>
// kernel: tpu_custom_call.1
= control target key start
LH: loop header
LB: loop body
LE: loop exit
PB: predicated region body
PF: predicated region fallthrough
CT: control target
= control target key end

     0   :  { %8 = vsyncpa [#allocation3], 0  ;;  %s287_s0 = inlined_call_operand.hbm [shape: f32[2,1024], index: 0, kind: input, shape index: {}]   ;;  %s288_s1 = inlined_call_operand.hbm [shape: f32[1,1024], index: 1, kind: input, shape index: {}]   ;;  %s289_s2 = inlined_call_operand.hbm [shape: f32[1,1024], index: 2, kind: input, shape index: {}]   ;;  %s290_s3 = inlined_call_operand.hbm [shape: f32[2,1024], index: 3, kind: output, shape index: {}]  }
   0x1   :  { %9 = vsyncpa [#allocation6], 0  ;;  %s27_s14 = sshll.u32 %s288_s1, 4  ;;  %s28_s14 = int_to_ptr.hbm [resolvable:$true] %s27_s14 }
   0x2   :  { %10 = vsyncpa [#allocation4], 0  ;;  %s239_s15 = smov [#allocation5]   ;;  %s16_s19 = sshll.u32 %s287_s0, 4  ;;  %s17_s19 = int_to_ptr.hbm [resolvable:$true] %s16_s19 }
   0x3   :  { %s29_s16 = sshll.u32 %s239_s15, 4  ;;  %s240_s20 = smov [#allocation2]   ;;  %s30_s16 = int_to_ptr.vmem [resolvable:$true] %s29_s16 }
   0x4   :  { %32 = dma.hbm_to_vmem [thread:$0]  %s28_s14, 128, %s30_s16, [#allocation6]  }
   0x5   :  { %s18_s21 = sshll.u32 %s240_s20, 4  ;;  %s38_s24 = sshll.u32 %s289_s2, 4  ;;  %s19_s21 = int_to_ptr.vmem [resolvable:$true] %s18_s21  ;;  %s39_s24 = int_to_ptr.hbm [resolvable:$true] %s38_s24 }
   0x6   :  { %21 = dma.hbm_to_vmem [thread:$0]  %s17_s19, 256, %s19_s21, [#allocation3]  }
   0x7   :  { %s241_s1 = smov [#allocation7]  }
   0x8   :  { %s40_s25 = sshll.u32 %s241_s1, 4  ;;  %s41_s25 = int_to_ptr.vmem [resolvable:$true] %s40_s25 }
   0x9   :  { %43 = dma.hbm_to_vmem [thread:$0]  %s39_s24, 128, %s41_s25, [#allocation6]  }
   0xa   :  { %233 = dma.done.wait [#allocation3], 256  }
   0xb   :  { %234 = vsyncadd [#allocation3], 4294967040 }
   0xc   :  { %235 = dma.done.wait [#allocation6], 256  }
   0xd   :  { %236 = vsyncadd [#allocation6], 4294967040  ;;  %v58_v0 = vld [vmem:[#allocation5] sm:$0xff]  ;;  %vm74_vm0 = vcmask 1041408   ;;  %vm76_vm1 = vcmask 1045508   ;;  %vm78_vm2 = vcmask 1043456  }
   0xe   :  { %v87_v1 = vld [vmem:[#allocation7] sm:$0xff]  ;;  %v60_v2 = vperm.slane %v58_v0, 0  ;;  %v61_v3 = vperm.slane %v58_v0, 1  ;;  %v62_v4 = vperm.slane %v58_v0, 2  ;;  %v63_v5 = vperm.slane %v58_v0, 3  ;;  %v56_v14 = vld [vmem:[#allocation2] sm:$0xff] }
   0xf   :  { %v89_v6 = vperm.slane %v87_v1, 0  ;;  %v90_v7 = vperm.slane %v87_v1, 1  ;;  %v91_v8 = vperm.slane %v87_v1, 2  ;;  %v92_v9 = vperm.slane %v87_v1, 3  ;;  %v57_v31 = vld [vmem:[#allocation2 + $0x8] sm:$0xff]  ;;  %s242_s0 = smov [#allocation8]  }
  0x10   :  { %v68_v10 = vrot.slane %v61_v3, 6  ;;  %v69_v11 = vrot.slane %v62_v4, 4  ;;  %v70_v12 = vrot.slane %v63_v5, 2  ;;  %v64_v13 = vperm.slane %v58_v0, 4  ;;  %s120_s2 = sshll.u32 %s242_s0, 4  ;;  %s122_s28 = sshll.u32 %s290_s3, 4  ;;  %s121_s2 = int_to_ptr.vmem [resolvable:$true] %s120_s2  ;;  %s123_s28 = int_to_ptr.hbm [resolvable:$true] %s122_s28 }
  0x11   :  { %v97_v15 = vrot.slane %v90_v7, 6  ;;  %v98_v16 = vrot.slane %v91_v8, 4  ;;  %v99_v17 = vrot.slane %v92_v9, 2  ;;  %v65_v18 = vperm.slane %v58_v0, 5 }
  0x12   :  { %v75_v19 = vsel %vm74_vm0, %v60_v2, %v68_v10  ;;  %v77_v20 = vsel %vm76_vm1, %v69_v11, %v70_v12  ;;  %v66_v21 = vperm.slane %v58_v0, 6  ;;  %v67_v22 = vperm.slane %v58_v0, 7 }
  0x13   :  { %v79_v23 = vsel %vm78_vm2, %v75_v19, %v77_v20  ;;  %v103_v24 = vsel %vm74_vm0, %v89_v6, %v97_v15  ;;  %v104_v25 = vsel %vm76_vm1, %v98_v16, %v99_v17  ;;  %v71_v26 = vrot.slane %v65_v18, 6 }
  0x14   :  { %v85_v27 = vmul.f32 %v79_v23, %v56_v14  ;;  %v105_v28 = vsel %vm78_vm2, %v103_v24, %v104_v25  ;;  %v72_v29 = vrot.slane %v66_v21, 4  ;;  %v73_v30 = vrot.slane %v67_v22, 2 }
  0x15   :  { %v80_v32 = vsel %vm74_vm0, %v64_v13, %v71_v26  ;;  %v93_v33 = vperm.slane %v87_v1, 4  ;;  %v94_v34 = vperm.slane %v87_v1, 5  ;;  %v95_v35 = vperm.slane %v87_v1, 6 }
  0x16   :  { %v111_v36 = vadd.f32 %v105_v28, %v85_v27  ;;  %v81_v37 = vsel %vm76_vm1, %v72_v29, %v73_v30  ;;  %v96_v38 = vperm.slane %v87_v1, 7 }
  0x17   :  { %v82_v39 = vsel %vm78_vm2, %v80_v32, %v81_v37  ;;  %v100_v40 = vrot.slane %v94_v34, 6  ;;  %v101_v41 = vrot.slane %v95_v35, 4 }
  0x18   :  { %113 = vst [vmem:[#allocation8] sm:$0xff] %v111_v36  ;;  %v86_v42 = vmul.f32 %v82_v39, %v57_v31  ;;  %v102_v43 = vrot.slane %v96_v38, 2 }
  0x19   :  { %v106_v44 = vsel %vm74_vm0, %v93_v33, %v100_v40 }
  0x1a   :  { %v107_v45 = vsel %vm76_vm1, %v101_v41, %v102_v43 }
  0x1b   :  { %v108_v46 = vsel %vm78_vm2, %v106_v44, %v107_v45 }
  0x1c   :  { %v112_v47 = vadd.f32 %v108_v46, %v86_v42 }
  0x1e   :  { %114 = vst [vmem:[#allocation8 + $0x8] sm:$0xff] %v112_v47 }
  0x1f   :  { %125 = dma.vmem_to_hbm [thread:$0]  %s121_s2, 256, %s123_s28, [#allocation4]  }
  0x20   :  { %237 = dma.done.wait [#allocation4], 256  }
  0x21   :  { %238 = vsyncadd [#allocation4], 4294967040 }
  0x22   :  { %130 = vsyncpa [#allocation3], 1 }
  0x23   :  { %131 = vsyncpa [#allocation6], 1 }
  0x24   :  { %132 = vsyncpa [#allocation4], 1 }

</bundles_post_ra>
